<compile_context>
chip_gen: v7x
topology: tpu7x:2x2x1
jax: 0.10.0
libtpu: 0.0.40
codegen_flags: <defaults>
</compile_context>

<pallas_src>
import functools

import jax
import jax.numpy as jnp
from jax.experimental import pallas as pl
from jax.experimental.pallas import tpu as pltpu


# ----------------------------------------------------------------------------
# Pallas kernel: fused fc1 + ReLU + fc2 + ReLU + fc3 (+ biases) on a batch tile
# ----------------------------------------------------------------------------
def _mlp_fused_kernel(x_ref, w1_ref, w2_ref, w3_ref, b_ref, o_ref):
    h1p = w1_ref.shape[1]
    h2p = w2_ref.shape[1]
    op = w3_ref.shape[1]

    # Activations arrive f32; cast to bf16 in-kernel (MXU-native operands,
    # f32 accumulate).  No bf16 copy of x ever touches HBM.
    x = x_ref[...].astype(jnp.bfloat16)

    # fc1 + bias + ReLU   (AvgPool1d is pre-folded into w1 — see prepare_params)
    h = jnp.dot(x, w1_ref[...], preferred_element_type=jnp.float32)
    h = jnp.maximum(h + b_ref[0:1, :h1p], 0.0)

    # Dropout(p=0.3) is identity at inference time.

    # fc2 + bias + ReLU
    h = jnp.dot(h.astype(jnp.bfloat16), w2_ref[...],
                preferred_element_type=jnp.float32)
    h = jnp.maximum(h + b_ref[1:2, :h2p], 0.0)

    # fc3 (logits, no activation)
    h = jnp.dot(h.astype(jnp.bfloat16), w3_ref[...],
                preferred_element_type=jnp.float32)
    o_ref[...] = (h + b_ref[2:3, :op]).astype(o_ref.dtype)


# ----------------------------------------------------------------------------
# Wrappers
# ----------------------------------------------------------------------------
def _round_up(x, m):
    return (x + m - 1) // m * m


def mlp_fused(flat, padded_params, out_features):
    """flat: (M, K) f32 flattened raw features -> (M, out_features) f32 logits."""
    w1, w2, w3, b_pack = padded_params
    M, K = flat.shape
    Kw, H1p = w1.shape
    H2p = w2.shape[1]
    Op = w3.shape[1]
    Bp = b_pack.shape[1]
    assert K == Kw, (K, Kw)

    # Batch tiling heuristic:
    #   M <= 128 : one grid step, block == full array (no padding, no extra op).
    #   M <= 256 : 128-row tiles -> >= 2 grid steps so both v7x TCs get work.
    #   M  > 256 : 256-row tiles to match the 256-wide MXU on v6e/v7x.
    if M <= 128:
        TM, Mp = M, M
        x_in = flat
    else:
        TM = 128 if M <= 256 else 256
        Mp = _round_up(M, TM)
        x_in = jnp.pad(flat, ((0, Mp - M), (0, 0)))

    out = pl.pallas_call(
        _mlp_fused_kernel,
        out_shape=jax.ShapeDtypeStruct((Mp, Op), jnp.float32),
        grid=(Mp // TM,),
        in_specs=[
            pl.BlockSpec((TM, K), lambda i: (i, 0)),    # activations (f32, tiled)
            pl.BlockSpec((Kw, H1p), lambda i: (0, 0)),  # fc1 weight (pool folded in)
            pl.BlockSpec((H1p, H2p), lambda i: (0, 0)), # fc2 weight
            pl.BlockSpec((H2p, Op), lambda i: (0, 0)),  # fc3 weight
            pl.BlockSpec((8, Bp), lambda i: (0, 0)),    # packed biases (rows 0/1/2)
        ],
        out_specs=pl.BlockSpec((TM, Op), lambda i: (i, 0)),
        compiler_params=pltpu.CompilerParams(
            dimension_semantics=("parallel",),
        ),
    )(x_in, w1, w2, w3, b_pack)

    # Strip batch/lane padding.  Serving code that accepts the padded layout
    # can consume `out` directly and drop this dispatch.
    return out[:M, :out_features]


def audio_mlp_forward(padded_params, x, *, out_features):
    """x: (B, C, n_mels, T) — same layout the PyTorch module is called with."""
    B = x.shape[0]
    # AvgPool1d + Flatten are folded into fc1's weight at init time, so the
    # only pre-kernel op is a free contiguous reshape.
    flat = x.reshape(B, -1)
    return mlp_fused(flat, padded_params, out_features)


# ----------------------------------------------------------------------------
# Parameters (deterministic, PyTorch-Linear-style init)
# ----------------------------------------------------------------------------
def init_params(key, in_features, hidden1, hidden2, out_features):
    def linear(k, fin, fout):
        kw, kb = jax.random.split(k)
        bound = 1.0 / jnp.sqrt(jnp.float32(fin))
        w = jax.random.uniform(kw, (fin, fout), minval=-bound, maxval=bound,
                               dtype=jnp.float32)
        b = jax.random.uniform(kb, (fout,), minval=-bound, maxval=bound,
                               dtype=jnp.float32)
        return w, b

    k1, k2, k3 = jax.random.split(key, 3)
    return {
        "fc1": linear(k1, in_features, hidden1),
        "fc2": linear(k2, hidden1, hidden2),
        "fc3": linear(k3, hidden2, out_features),
    }


def prepare_params(params, *, channels, n_mels, time_steps, time_reduce):
    """One-time, off-hot-path parameter preparation.

    * AvgPool1d(kernel=stride=time_reduce) is linear, so it is folded EXACTLY
      into fc1's weight: each pooled-step weight row is divided by
      time_reduce and replicated across its time_reduce raw time columns;
      any truncated tail time columns get zero weight (matches PyTorch's
      AvgPool1d truncation).
    * Weights are padded to lane-dense multiples of 128 (zero rows/cols) and
      cast to bf16.
    * The three f32 biases are packed into one (8, 128k) block, rows 0/1/2.
    """
    w1, b1 = params["fc1"]
    w2, b2 = params["fc2"]
    w3, b3 = params["fc3"]

    cm = channels * n_mels
    n_pooled = time_steps // time_reduce
    assert w1.shape[0] == cm * n_pooled, (w1.shape, cm, n_pooled)

    # --- fold AvgPool1d + Flatten into fc1's weight ---
    H1 = w1.shape[1]
    w1f = w1.reshape(cm, n_pooled, H1) / jnp.float32(time_reduce)
    w1f = jnp.repeat(w1f, time_reduce, axis=1)            # (cm, n_pooled*tr, H1)
    tail = time_steps - n_pooled * time_reduce            # truncated remainder
    if tail:
        w1f = jnp.pad(w1f, ((0, 0), (0, tail), (0, 0)))   # zero weight == truncation
    w1f = w1f.reshape(cm * time_steps, H1)                 # (K_raw, H1)

    H2, O = w2.shape[1], w3.shape[1]
    H1p, H2p, Op = _round_up(H1, 128), _round_up(H2, 128), _round_up(O, 128)

    def pad_to(w, rows, cols):
        return jnp.pad(w, ((0, rows - w.shape[0]), (0, cols - w.shape[1])))

    w1p = pad_to(w1f, w1f.shape[0], H1p).astype(jnp.bfloat16)   # (K_raw, H1p)
    w2p = pad_to(w2, H1p, H2p).astype(jnp.bfloat16)             # (H1p, H2p)
    w3p = pad_to(w3, H2p, Op).astype(jnp.bfloat16)              # (H2p, Op)

    Bp = max(H1p, H2p, Op)
    b_pack = jnp.zeros((8, Bp), jnp.float32)
    b_pack = b_pack.at[0, :H1].set(b1)
    b_pack = b_pack.at[1, :H2].set(b2)
    b_pack = b_pack.at[2, :O].set(b3)

    return (w1p, w2p, w3p, b_pack)


# ----------------------------------------------------------------------------
# Pure-JAX reference (f32) for a sanity check
# ----------------------------------------------------------------------------
def audio_mlp_reference(params, x, *, time_reduce):
    B, T = x.shape[0], x.shape[-1]
    tr = time_reduce
    T_eff = (T // tr) * tr
    pooled = x[..., :T_eff].reshape(x.shape[:-1] + (T_eff // tr, tr)).mean(-1)
    flat = pooled.reshape(B, -1)
    w1, b1 = params["fc1"]
    w2, b2 = params["fc2"]
    w3, b3 = params["fc3"]
    h = jnp.maximum(flat @ w1 + b1, 0.0)
    h = jnp.maximum(h @ w2 + b2, 0.0)
    return h @ w3 + b3


# ----------------------------------------------------------------------------
if __name__ == "__main__":
    key = jax.random.PRNGKey(0)
    k_params, k_x = jax.random.split(key)

    # Small shapes consistent with the module:
    #   x: (batch=2, channels=1, n_mels=16, time=16), time_reduce=2
    #   -> n_steps = 8, fc1 in_features = n_steps * n_mels = 128.
    batch, channels, n_mels, time_steps = 2, 1, 16, 16
    time_reduce = 2
    n_steps = time_steps // time_reduce
    hidden1, hidden2, out_features = 128, 64, 10

    params = init_params(k_params, n_steps * n_mels, hidden1, hidden2,
                         out_features)
    padded_params = prepare_params(params, channels=channels, n_mels=n_mels,
                                   time_steps=time_steps,
                                   time_reduce=time_reduce)

    x = jax.random.normal(
        k_x, (batch, channels, n_mels, time_steps), dtype=jnp.float32)

    fwd = jax.jit(functools.partial(audio_mlp_forward,
                                    out_features=out_features))
    logits = jax.block_until_ready(fwd(padded_params, x))

    assert logits.shape == (batch, out_features), logits.shape
    assert bool(jnp.all(jnp.isfinite(logits)))

    # Sanity check vs. an f32 XLA reference (kernel uses bf16 MXU operands).
    ref = audio_mlp_reference(params, x, time_reduce=time_reduce)
    max_err = float(jnp.max(jnp.abs(logits - ref)))
    assert max_err < 0.1, f"max |err| = {max_err}"

    print("KERNEL_OK")
</pallas_src>

<mosaic_0001>
module attributes {stable_mosaic.version = 11 : i64} {
  func.func @_mlp_fused_kernel(%arg0: i32, %arg1: memref<2x256xf32, #tpu.memory_space<vmem>>, %arg2: memref<256x128xbf16, #tpu.memory_space<vmem>>, %arg3: memref<128x128xbf16, #tpu.memory_space<vmem>>, %arg4: memref<128x128xbf16, #tpu.memory_space<vmem>>, %arg5: memref<8x128xf32, #tpu.memory_space<vmem>>, %arg6: memref<2x128xf32, #tpu.memory_space<vmem>>) attributes {dimension_semantics = [#tpu.dimension_semantics<parallel>], iteration_bounds = array<i64: 1>, scalar_prefetch = 0 : i64, scratch_operands = 0 : i64, tpu.core_type = #tpu.core_type<tc>, window_params = [{transform_indices = @transform_0, window_bounds = array<i64: 2, 256>}, {pipeline_mode = #tpu.pipeline_mode<synchronous>, transform_indices = @transform_1, window_bounds = array<i64: 256, 128>}, {pipeline_mode = #tpu.pipeline_mode<synchronous>, transform_indices = @transform_2, window_bounds = array<i64: 128, 128>}, {pipeline_mode = #tpu.pipeline_mode<synchronous>, transform_indices = @transform_3, window_bounds = array<i64: 128, 128>}, {pipeline_mode = #tpu.pipeline_mode<synchronous>, transform_indices = @transform_4, window_bounds = array<i64: 8, 128>}, {transform_indices = @transform_5, window_bounds = array<i64: 2, 128>}]} {
    %c0 = arith.constant 0 : index
    %c0_0 = arith.constant 0 : index
    %0 = vector.load %arg1[%c0, %c0_0] : memref<2x256xf32, #tpu.memory_space<vmem>>, vector<2x256xf32>
    %1 = arith.truncf %0 : vector<2x256xf32> to vector<2x256xbf16>
    %c0_1 = arith.constant 0 : index
    %c0_2 = arith.constant 0 : index
    %2 = vector.load %arg2[%c0_1, %c0_2] : memref<256x128xbf16, #tpu.memory_space<vmem>>, vector<256x128xbf16>
    %cst = arith.constant dense<0.000000e+00> : vector<2x128xf32>
    %3 = tpu.matmul %1, %2, %cst {dimension_numbers = #tpu.dot_dimension_numbers<[1], [0], [0], [1], [0, 0, 1, 1], [], []>} : vector<2x256xbf16>, vector<256x128xbf16>, vector<2x128xf32> -> vector<2x128xf32>
    %c0_3 = arith.constant 0 : index
    %c0_4 = arith.constant 0 : index
    %4 = vector.load %arg5[%c0_3, %c0_4] : memref<8x128xf32, #tpu.memory_space<vmem>>, vector<1x128xf32>
    %5 = vector.broadcast %4 : vector<1x128xf32> to vector<2x128xf32>
    %6 = arith.addf %3, %5 : vector<2x128xf32>
    %cst_5 = arith.constant 0.000000e+00 : f32
    %7 = vector.broadcast %cst_5 : f32 to vector<2x128xf32>
    %8 = arith.maximumf %6, %7 : vector<2x128xf32>
    %9 = arith.truncf %8 : vector<2x128xf32> to vector<2x128xbf16>
    %c0_6 = arith.constant 0 : index
    %c0_7 = arith.constant 0 : index
    %10 = vector.load %arg3[%c0_6, %c0_7] : memref<128x128xbf16, #tpu.memory_space<vmem>>, vector<128x128xbf16>
    %cst_8 = arith.constant dense<0.000000e+00> : vector<2x128xf32>
    %11 = tpu.matmul %9, %10, %cst_8 {dimension_numbers = #tpu.dot_dimension_numbers<[1], [0], [0], [1], [0, 0, 1, 1], [], []>} : vector<2x128xbf16>, vector<128x128xbf16>, vector<2x128xf32> -> vector<2x128xf32>
    %c1 = arith.constant 1 : index
    %c0_9 = arith.constant 0 : index
    %12 = vector.load %arg5[%c1, %c0_9] : memref<8x128xf32, #tpu.memory_space<vmem>>, vector<1x128xf32>
    %13 = vector.broadcast %12 : vector<1x128xf32> to vector<2x128xf32>
    %14 = arith.addf %11, %13 : vector<2x128xf32>
    %cst_10 = arith.constant 0.000000e+00 : f32
    %15 = vector.broadcast %cst_10 : f32 to vector<2x128xf32>
    %16 = arith.maximumf %14, %15 : vector<2x128xf32>
    %17 = arith.truncf %16 : vector<2x128xf32> to vector<2x128xbf16>
    %c0_11 = arith.constant 0 : index
    %c0_12 = arith.constant 0 : index
    %18 = vector.load %arg4[%c0_11, %c0_12] : memref<128x128xbf16, #tpu.memory_space<vmem>>, vector<128x128xbf16>
    %cst_13 = arith.constant dense<0.000000e+00> : vector<2x128xf32>
    %19 = tpu.matmul %17, %18, %cst_13 {dimension_numbers = #tpu.dot_dimension_numbers<[1], [0], [0], [1], [0, 0, 1, 1], [], []>} : vector<2x128xbf16>, vector<128x128xbf16>, vector<2x128xf32> -> vector<2x128xf32>
    %c2 = arith.constant 2 : index
    %c0_14 = arith.constant 0 : index
    %20 = vector.load %arg5[%c2, %c0_14] : memref<8x128xf32, #tpu.memory_space<vmem>>, vector<1x128xf32>
    %21 = vector.broadcast %20 : vector<1x128xf32> to vector<2x128xf32>
    %22 = arith.addf %19, %21 : vector<2x128xf32>
    %c0_15 = arith.constant 0 : index
    %c0_16 = arith.constant 0 : index
    %23 = vector.load %arg6[%c0_15, %c0_16] : memref<2x128xf32, #tpu.memory_space<vmem>>, vector<2x128xf32>
    tpu.vector_store %arg6[%c0_15, %c0_16], %22 {strides = array<i32>} : memref<2x128xf32, #tpu.memory_space<vmem>>, vector<2x128xf32>,
    return
  }
  func.func @transform_0(%arg0: i32) -> (i32, i32) {
    %c0_i32 = arith.constant 0 : i32
    %c0_i32_0 = arith.constant 0 : i32
    return %arg0, %c0_i32 : i32, i32
  }
  func.func @transform_1(%arg0: i32) -> (i32, i32) {
    %c0_i32 = arith.constant 0 : i32
    %c0_i32_0 = arith.constant 0 : i32
    %c0_i32_1 = arith.constant 0 : i32
    return %c0_i32, %c0_i32_0 : i32, i32
  }
  func.func @transform_2(%arg0: i32) -> (i32, i32) {
    %c0_i32 = arith.constant 0 : i32
    %c0_i32_0 = arith.constant 0 : i32
    %c0_i32_1 = arith.constant 0 : i32
    return %c0_i32, %c0_i32_0 : i32, i32
  }
  func.func @transform_3(%arg0: i32) -> (i32, i32) {
    %c0_i32 = arith.constant 0 : i32
    %c0_i32_0 = arith.constant 0 : i32
    %c0_i32_1 = arith.constant 0 : i32
    return %c0_i32, %c0_i32_0 : i32, i32
  }
  func.func @transform_4(%arg0: i32) -> (i32, i32) {
    %c0_i32 = arith.constant 0 : i32
    %c0_i32_0 = arith.constant 0 : i32
    %c0_i32_1 = arith.constant 0 : i32
    return %c0_i32, %c0_i32_0 : i32, i32
  }
  func.func @transform_5(%arg0: i32) -> (i32, i32) {
    %c0_i32 = arith.constant 0 : i32
    %c0_i32_0 = arith.constant 0 : i32
    return %arg0, %c0_i32 : i32, i32
  }
}

</mosaic_0001>

<bundles_post_ra>
// kernel: audio_mlp_forward.1
= control target key start
LH: loop header
LB: loop body
LE: loop exit
PB: predicated region body
PF: predicated region fallthrough
CT: control target
= control target key end

     0   :  { %10 = vsyncpa [#allocation3], 0  ;;  %s871_s0 = inlined_call_operand.vmem [shape: f32[2,256], index: 0, kind: input, shape index: {}]   ;;  %s872_s1 = inlined_call_operand.hbm [shape: bf16[256,128], index: 1, kind: input, shape index: {}]   ;;  %s873_s2 = inlined_call_operand.hbm [shape: bf16[128,128], index: 2, kind: input, shape index: {}]   ;;  %s874_s3 = inlined_call_operand.hbm [shape: bf16[128,128], index: 3, kind: input, shape index: {}]   ;;  %s875_s4 = inlined_call_operand.vmem [shape: f32[8,128], index: 4, kind: input, shape index: {}]   ;;  %s876_s5 = inlined_call_operand.hbm [shape: f32[2,128], index: 5, kind: output, shape index: {}]  }
   0x1   :  { %11 = vsyncpa [#allocation6], 0 }
   0x2   :  { %12 = vsyncpa [#allocation4], 0  ;;  %s739_s18 = smov [#allocation5]   ;;  %s740_s20 = smov [#allocation2]  }
   0x3   :  { %s32_s19 = sshll.u32 %s739_s18, 4  ;;  %s20_s21 = sshll.u32 %s740_s20, 4  ;;  %s33_s19 = int_to_ptr.vmem [resolvable:$true] %s32_s19  ;;  %s777_s21 = int_to_ptr.vmem [resolvable:$true] %s20_s21 }
   0x4   :  { %s645_s24 = scalar_lea.hbm %s873_s2, 1024 }
   0x5   :  { %p646_p0 = scmp.ne.s32.totalorder %s873_s2, %s645_s24  ;;  %p649_p1 = scmp.lt.u32.totalorder %s645_s24, %s873_s2 }
   0x7   :  { %p651_p2 = pnand %p649_p1, %p646_p0 }
   0x9   :  { %654 = shalt.err (!%p651_p2)
}
   0xa   :  { %s655_s29 = scalar_lea.vmem %s33_s19, 1024  ;;  %p660_p4 = scmp.lt.s32.totalorder %s33_s19, %s33_s19 }
   0xb   :  { %p656_p3 = scmp.ne.s32.totalorder %s33_s19, %s655_s29  ;;  %p661_p5 = scmp.lt.s32.totalorder %s655_s29, %s655_s29 }
   0xd   :  { %p662_p6 = por %p661_p5, %p660_p4 }
   0xf   :  { %p663_p7 = pnand %p662_p6, %p656_p3 }
  0x11   :  { %666 = shalt.err (!%p663_p7)
}
  0x12   :  { %s741_s30 = smov 64   ;;  %s742_s6 = smov 4  }
  0x13   :  { %38 = dma.hbm_to_vmem [thread:$0]  %s873_s2, 1024, %s33_s19, [#allocation6], %s741_s30, %s741_s30, %s742_s6  }
  0x14   :  { %s667_s11 = scalar_lea.hbm %s872_s1, 2048 }
  0x15   :  { %p668_p8 = scmp.ne.s32.totalorder %s872_s1, %s667_s11  ;;  %p671_p9 = scmp.lt.u32.totalorder %s667_s11, %s872_s1 }
  0x17   :  { %p673_p10 = pnand %p671_p9, %p668_p8 }
  0x19   :  { %676 = shalt.err (!%p673_p10)
}
  0x1a   :  { %s677_s16 = scalar_lea.vmem %s777_s21, 2048  ;;  %p682_p12 = scmp.lt.s32.totalorder %s777_s21, %s777_s21 }
  0x1b   :  { %p678_p11 = scmp.ne.s32.totalorder %s777_s21, %s677_s16  ;;  %p683_p13 = scmp.lt.s32.totalorder %s677_s16, %s677_s16 }
  0x1d   :  { %p684_p0 = por %p683_p13, %p682_p12 }
  0x1f   :  { %p685_p1 = pnand %p684_p0, %p678_p11 }
  0x21   :  { %688 = shalt.err (!%p685_p1)
}
  0x22   :  { %26 = dma.hbm_to_vmem [thread:$0]  %s872_s1, 2048, %s777_s21, [#allocation3], %s741_s30, %s741_s30, %s742_s6  }
  0x23   :  { %s743_s18 = smov [#allocation7]   ;;  %s689_s23 = scalar_lea.hbm %s874_s3, 1024 }
  0x24   :  { %s44_s19 = sshll.u32 %s743_s18, 4  ;;  %p690_p2 = scmp.ne.s32.totalorder %s874_s3, %s689_s23  ;;  %s45_s19 = int_to_ptr.vmem [resolvable:$true] %s44_s19 }
  0x25   :  { %p693_p3 = scmp.lt.u32.totalorder %s689_s23, %s874_s3 }
  0x27   :  { %p695_p4 = pnand %p693_p3, %p690_p2 }
  0x29   :  { %698 = shalt.err (!%p695_p4)
}
  0x2a   :  { %s699_s28 = scalar_lea.vmem %s45_s19, 1024  ;;  %p704_p6 = scmp.lt.s32.totalorder %s45_s19, %s45_s19 }
  0x2b   :  { %p700_p5 = scmp.ne.s32.totalorder %s45_s19, %s699_s28  ;;  %p705_p7 = scmp.lt.s32.totalorder %s699_s28, %s699_s28 }
  0x2d   :  { %p706_p8 = por %p705_p7, %p704_p6 }
  0x2f   :  { %p707_p9 = pnand %p706_p8, %p700_p5 }
  0x31   :  { %710 = shalt.err (!%p707_p9)
}
  0x32   :  { %50 = dma.hbm_to_vmem [thread:$0]  %s874_s3, 1024, %s45_s19, [#allocation6], %s741_s30, %s741_s30, %s742_s6  }
  0x33   :  { %733 = dma.done.wait [#allocation3], 2048  }
  0x34   :  { %734 = vsyncadd [#allocation3], 4294965248 }
  0x35   :  { %735 = dma.done.wait [#allocation6], 2048  }
  0x36   :  { %736 = vsyncadd [#allocation6], 4294965248  ;;  %v744_v0 = vmov 0.0   ;;  %v613_v1 = vld [vmem:[#allocation2 + $0x40] sm:$0xff]   ;;  %v615_v3 = vld [vmem:[#allocation2 + $0x48] sm:$0xff]   ;;  %vm745_vm0 = vmmov 0  }
  0x37   :  { %565 = vmatprep.subr.bf16.mxu1 %v744_v0  ;;  %v614_v2 = vld [vmem:[#allocation2] sm:$0xff]   ;;  %525 = vmatprep.subr.bf16.mxu0 %v613_v1  ;;  %v616_v4 = vld [vmem:[#allocation2 + $0x8] sm:$0xff]   ;;  %v617_v5 = vld [vmem:[#allocation2 + $0x50] sm:$0xff]   ;;  %s746_s10 = smov [#allocation8]  }
  0x38   :  { %526 = vmatpush3.bf16.msra.mxu0 %v614_v2  ;;  %v618_v6 = vld [vmem:[#allocation2 + $0x10] sm:$0xff]   ;;  %v619_v7 = vld [vmem:[#allocation2 + $0x58] sm:$0xff]   ;;  %v621_v9 = vld [vmem:[#allocation2 + $0x60] sm:$0xff]   ;;  %581 = vmatprep.mubr.msk.bf16.mxu1 %vm745_vm0, %v744_v0  ;;  %s479_s11 = sshll.u32 %s746_s10, 4  ;;  %s480_s11 = int_to_ptr.vmem [resolvable:$true] %s479_s11 }
  0x39   :  { %527 = vmatprep.subr.bf16.mxu0 %v615_v3  ;;  %v620_v8 = vld [vmem:[#allocation2 + $0x18] sm:$0xff]   ;;  %v622_v10 = vld [vmem:[#allocation2 + $0x20] sm:$0xff]   ;;  %v623_v11 = vld [vmem:[#allocation2 + $0x68] sm:$0xff]   ;;  %s711_s12 = scalar_lea.vmem %s480_s11, 32  ;;  %p716_p11 = scmp.lt.s32.totalorder %s480_s11, %s480_s11 }
  0x3a   :  { %v489_v12 = vld.sshfl [vmem:[%s871_s0] sm:$0x33 pattern:$0x76325410]  ;;  %v624_v15 = vld [vmem:[#allocation2 + $0x28] sm:$0xff]   ;;  %v625_v18 = vld [vmem:[#allocation2 + $0x70] sm:$0xff]   ;;  %p712_p10 = scmp.ne.s32.totalorder %s480_s11, %s711_s12  ;;  %p717_p12 = scmp.lt.s32.totalorder %s711_s12, %s711_s12 }
  0x3b   :  { %v72_v13 = vcombine.high %v489_v12, %v489_v12  ;;  %v629_v14 = vld [vmem:[#allocation5] sm:$0xff]   ;;  %v630_v17 = vld [vmem:[#allocation5 + $0x8] sm:$0xff]   ;;  %v626_v19 = vld [vmem:[#allocation2 + $0x30] sm:$0xff]   ;;  %v75_v24 = vpack.c.bf16 %v489_v12, %v489_v12 }
  0x3c   :  { %528 = vmatpush3.bf16.msra.mxu0 %v616_v4  ;;  %566 = vmatpush3.bf16.msra.mxu1 %v629_v14  ;;  %v627_v20 = vld [vmem:[#allocation2 + $0x78] sm:$0xff]   ;;  %v631_v21 = vld [vmem:[#allocation5 + $0x10] sm:$0xff]   ;;  %v633_v25 = vld [vmem:[#allocation5 + $0x20] sm:$0xff]   ;;  %p718_p13 = por %p717_p12, %p716_p11 }
  0x3d   :  { %529 = vmatprep.subr.bf16.mxu0 %v617_v5  ;;  %v76_v16 = vpack.c.bf16 %v72_v13, %v72_v13  ;;  %567 = vmatprep.subr.bf16.mxu1 %v744_v0  ;;  %v628_v22 = vld [vmem:[#allocation2 + $0x38] sm:$0xff]   ;;  %v634_v26 = vld [vmem:[#allocation5 + $0x28] sm:$0xff]   ;;  %v635_v27 = vld [vmem:[#allocation5 + $0x30] sm:$0xff]  }
  0x3e   :  { %v632_v23 = vld [vmem:[#allocation5 + $0x18] sm:$0xff]   ;;  %v637_v29 = vld [vmem:[#allocation7] sm:$0xff]   ;;  %v638_v30 = vld [vmem:[#allocation7 + $0x8] sm:$0xff]   ;;  %p719_p0 = pnand %p718_p13, %p712_p10 }
  0x3f   :  { %242 = vmatprep.mubr.bf16.mxu0 %v76_v16  ;;  %v636_v28 = vld [vmem:[#allocation5 + $0x38] sm:$0xff]   ;;  %v639_v31 = vld [vmem:[#allocation7 + $0x10] sm:$0xff]   ;;  %v641_v33 = vld [vmem:[#allocation7 + $0x20] sm:$0xff]  }
  0x40   :  { %530 = vmatpush3.bf16.msra.mxu0 %v618_v6  ;;  %568 = vmatpush3.bf16.msra.mxu1 %v630_v17  ;;  %v640_v32 = vld [vmem:[#allocation7 + $0x18] sm:$0xff]   ;;  %v642_v34 = vld [vmem:[#allocation7 + $0x28] sm:$0xff]   ;;  %v490_v36 = vld [vmem:[%s875_s4] ss:$0 sm:$0xff] }
  0x41   :  { %531 = vmatprep.subr.bf16.mxu0 %v619_v7  ;;  %569 = vmatprep.subr.bf16.mxu1 %v744_v0  ;;  %v643_v44 = vld [vmem:[#allocation7 + $0x30] sm:$0xff]   ;;  %v644_v45 = vld [vmem:[#allocation7 + $0x38] sm:$0xff]   ;;  %v507_v46 = vld [vmem:[%s875_s4 + $0x1] ss:$0 sm:$0xff] }
  0x42   :  { %v516_v54 = vld [vmem:[%s875_s4 + $0x2] ss:$0 sm:$0xff] }
  0x44   :  { %532 = vmatpush3.bf16.msra.mxu0 %v620_v8  ;;  %570 = vmatpush3.bf16.msra.mxu1 %v631_v21 }
  0x45   :  { %533 = vmatprep.subr.bf16.mxu0 %v621_v9  ;;  %571 = vmatprep.subr.bf16.mxu1 %v744_v0 }
  0x48   :  { %534 = vmatpush3.bf16.msra.mxu0 %v622_v10  ;;  %572 = vmatpush3.bf16.msra.mxu1 %v632_v23 }
  0x49   :  { %535 = vmatprep.subr.bf16.mxu0 %v623_v11  ;;  %573 = vmatprep.subr.bf16.mxu1 %v744_v0 }
  0x4c   :  { %536 = vmatpush3.bf16.msra.mxu0 %v624_v15  ;;  %574 = vmatpush3.bf16.msra.mxu1 %v633_v25 }
  0x4d   :  { %537 = vmatprep.subr.bf16.mxu0 %v625_v18  ;;  %575 = vmatprep.subr.bf16.mxu1 %v744_v0 }
  0x50   :  { %538 = vmatpush3.bf16.msra.mxu0 %v626_v19  ;;  %576 = vmatpush3.bf16.msra.mxu1 %v634_v26 }
  0x51   :  { %539 = vmatprep.subr.bf16.mxu0 %v627_v20  ;;  %577 = vmatprep.subr.bf16.mxu1 %v744_v0 }
  0x54   :  { %540 = vmatpush3.bf16.msra.mxu0 %v628_v22  ;;  %578 = vmatpush3.bf16.msra.mxu1 %v635_v27 }
  0x55   :  { %585 = vmatprep.subr.bf16.mxu0 %v744_v0  ;;  %579 = vmatprep.subr.bf16.mxu1 %v744_v0 }
  0x57   :  { %243 = vmatmul.mubr.bf16.vlgmr.msra.gmra.mrb[0].mxu0 %v75_v24 }
  0x58   :  { %580 = vmatpush3.bf16.msra.mxu1 %v636_v28  ;;  %601 = vmatprep.mubr.msk.bf16.mxu0 %vm745_vm0, %v744_v0 }
  0x59   :  { %586 = vmatpush3.bf16.msra.mxu0 %v637_v29 }
  0x5a   :  { %587 = vmatprep.subr.bf16.mxu0 %v744_v0 }
  0x5d   :  { %588 = vmatpush3.bf16.msra.mxu0 %v638_v30 }
  0x5e   :  { %589 = vmatprep.subr.bf16.mxu0 %v744_v0 }
  0x61   :  { %590 = vmatpush3.bf16.msra.mxu0 %v639_v31 }
  0x62   :  { %591 = vmatprep.subr.bf16.mxu0 %v744_v0 }
  0x65   :  { %592 = vmatpush3.bf16.msra.mxu0 %v640_v32 }
  0x66   :  { %593 = vmatprep.subr.bf16.mxu0 %v744_v0 }
  0x69   :  { %594 = vmatpush3.bf16.msra.mxu0 %v641_v33 }
  0x6a   :  { %595 = vmatprep.subr.bf16.mxu0 %v744_v0 }
  0x6d   :  { %596 = vmatpush3.bf16.msra.mxu0 %v642_v34 }
  0x6e   :  { %597 = vmatprep.subr.bf16.mxu0 %v744_v0 }
  0x71   :  { %598 = vmatpush3.bf16.msra.mxu0 %v643_v44 }
  0x72   :  { %599 = vmatprep.subr.bf16.mxu0 %v744_v0 }
  0x75   :  { %600 = vmatpush3.bf16.msra.mxu0 %v644_v45 }
 0x12a   :  { %v541_v35 = vpop.f32.mrb[0].mxu0 }
 0x12b   :  { %v542_v37 = vpop.f32.mrb[1].mxu0 }
 0x12c   :  { %v543_v38 = vadd.f32 %v542_v37, %v541_v35  ;;  %v544_v39 = vpop.f32.mrb[2].mxu0 }
 0x12d   :  { %v545_v40 = vpop.f32.mrb[3].mxu0 }
 0x12e   :  { %v245_v41 = vadd.f32 %v543_v38, %v490_v36 }
 0x130   :  { %v250_v42 = vmax.f32 %v245_v41, 0.0 }
 0x132   :  { %v251_v43 = vpack.c.bf16 %v250_v42, %v250_v42 }
 0x134   :  { %582 = vmatmul.mubr.bf16.vlgmr.msra.gmra.mrb[0].mxu1 %v251_v43 }
 0x207   :  { %v355_v47 = vpop.f32.mrb[0].mxu1 }
 0x208   :  { %v356_v48 = vadd.f32 %v507_v46, %v355_v47  ;;  %v583_v49 = vpop.f32.mrb[1].mxu1 }
 0x209   :  { %v358_v50 = vpop.f32.mrb[2].mxu1 }
 0x20a   :  { %v361_v51 = vmax.f32 %v356_v48, 0.0  ;;  %v584_v52 = vpop.f32.mrb[3].mxu1 }
 0x20c   :  { %v362_v53 = vpack.c.bf16 %v361_v51, %v361_v51 }
 0x20e   :  { %602 = vmatmul.mubr.bf16.vlgmr.msra.gmra.mrb[4].mxu0 %v362_v53 }
 0x2e1   :  { %v466_v55 = vpop.f32.mrb[4].mxu0 }
 0x2e2   :  { %v467_v56 = vadd.f32 %v516_v54, %v466_v55  ;;  %v603_v57 = vpop.f32.mrb[5].mxu0 }
 0x2e3   :  { %v469_v58 = vpop.f32.mrb[6].mxu0 }
 0x2e4   :  { %472 = vst [vmem:[#allocation8] sm:$0x3] %v467_v56  ;;  %v604_v59 = vpop.f32.mrb[7].mxu0 }
 0x2e5   :  { %722 = shalt.err (!%p719_p0)
}
 0x2e6   :  { %s723_s4 = scalar_lea.hbm %s876_s5, 32 }
 0x2e7   :  { %p724_p1 = scmp.ne.s32.totalorder %s876_s5, %s723_s4  ;;  %p727_p2 = scmp.lt.u32.totalorder %s723_s4, %s876_s5 }
 0x2e9   :  { %p729_p3 = pnand %p727_p2, %p724_p1 }
 0x2eb   :  { %732 = shalt.err (!%p729_p3)
}
 0x2ec   :  { %482 = dma.vmem_to_hbm [thread:$0]  %s480_s11, 32, %s876_s5, [#allocation4]  }
 0x2ed   :  { %737 = dma.done.wait [#allocation4], 32  }
 0x2ee   :  { %738 = vsyncadd [#allocation4], 4294967264 }
 0x2ef   :  { %486 = vsyncpa [#allocation3], 1 }
 0x2f0   :  { %487 = vsyncpa [#allocation6], 1 }
 0x2f1   :  { %488 = vsyncpa [#allocation4], 1 }

</bundles_post_ra>
